<compile_context>
chip_gen: v6e
topology: v6e:2x2x1
jax: 0.10.0
libtpu: 0.0.40
codegen_flags: <defaults>
</compile_context>

<pallas_src>
import jax
import jax.numpy as jnp
from jax.experimental import pallas as pl
from jax.experimental.pallas import tpu as pltpu


def _round_up(x, m):
    return (x + m - 1) // m * m


def _rpnet_decoder_kernel(x1_ref, x2_ref, p_ref, o_ref):
    """One batch tile: (Bt, Dp) -> (Bt, 2).

    p_ref is the packed parameter block (8, Dp):
      row 0 : W[0, :] zero-padded to Dp   (weights for logit 0)
      row 1 : W[1, :] zero-padded to Dp   (weights for logit 1)
      row 2 : [b0, b1, 0, ...]            (bias)
      rows 3..7 : zero padding (sublane alignment)
    """
    # |x1 - x2| on the VPU, f32 everywhere.
    diff = jnp.abs(x1_ref[...] - x2_ref[...])                      # (Bt, Dp)

    # N=2 projection: VPU multiply + XLU lane reduction (no tiny MXU matmul).
    s0 = jnp.sum(diff * p_ref[0:1, :], axis=-1, keepdims=True)     # (Bt, 1)
    s1 = jnp.sum(diff * p_ref[1:2, :], axis=-1, keepdims=True)     # (Bt, 1)

    col = jax.lax.broadcasted_iota(jnp.int32, o_ref.shape, 1)      # (Bt, 2)
    out = jnp.where(col == 0, s0, s1) + p_ref[2:3, 0:2]            # + bias
    o_ref[...] = out.astype(o_ref.dtype)


def pack_params(w, b, *, lane=128, sublane=8):
    """Pack W (2, D) and b (2,) once at init into one (8, Dp) f32 block."""
    out_dim, d = w.shape
    dp = _round_up(d, lane)
    packed = jnp.zeros((sublane, dp), jnp.float32)
    packed = packed.at[:out_dim, :d].set(w.astype(jnp.float32))
    packed = packed.at[out_dim, :out_dim].set(b.astype(jnp.float32))
    return packed


def rpnet_decoder(x1, x2, packed_params, *, block_b=512):
    """x1, x2: (B, D) float32; packed_params: (8, Dp) from pack_params.
    Returns (B, 2) float32 == |x1 - x2| @ W.T + b."""
    assert block_b % 8 == 0
    b_in, d = x1.shape
    assert x2.shape == x1.shape
    dp = packed_params.shape[1]
    assert dp >= d
    out_dim = 2

    # Batch tile: as large as allowed, padded to a sublane multiple.
    bt = min(block_b, _round_up(b_in, 8))
    bp = _round_up(b_in, bt)

    # Zero-pad batch to the tile size and the feature dim to the lane-padded
    # width of the packed params (padded input lanes hit zero weight lanes).
    pad_b, pad_d = bp - b_in, dp - d
    if pad_b or pad_d:
        x1 = jnp.pad(x1, ((0, pad_b), (0, pad_d)))
        x2 = jnp.pad(x2, ((0, pad_b), (0, pad_d)))

    out = pl.pallas_call(
        _rpnet_decoder_kernel,
        out_shape=jax.ShapeDtypeStruct((bp, out_dim), jnp.float32),
        grid_spec=pltpu.PrefetchScalarGridSpec(
            num_scalar_prefetch=0,
            grid=(bp // bt,),
            in_specs=[
                pl.BlockSpec((bt, dp), lambda i: (i, 0)),
                pl.BlockSpec((bt, dp), lambda i: (i, 0)),
                # Constant index map: params stay resident in VMEM across steps.
                pl.BlockSpec((8, dp), lambda i: (0, 0)),
            ],
            out_specs=pl.BlockSpec((bt, out_dim), lambda i: (i, 0)),
        ),
        compiler_params=pltpu.CompilerParams(
            # Batch tiles are independent -> shard across both TCs on v7x.
            dimension_semantics=("parallel",),
        ),
    )(x1, x2, packed_params)
    return out[:b_in]


def init_params(key, embed_dim, out_dim=2):
    # nn.Linear default init: U(-1/sqrt(fan_in), +1/sqrt(fan_in)).
    kw, kb = jax.random.split(key)
    bound = 1.0 / jnp.sqrt(embed_dim)
    w = jax.random.uniform(kw, (out_dim, embed_dim), jnp.float32, -bound, bound)
    b = jax.random.uniform(kb, (out_dim,), jnp.float32, -bound, bound)
    return w, b


if __name__ == "__main__":
    key = jax.random.PRNGKey(0)
    k1, k2, k3, k4, kp = jax.random.split(key, 5)

    embed_dim = 100          # module default
    batch = 16               # small deterministic example

    w, b = init_params(kp, embed_dim)            # w: (2, 100), b: (2,)
    packed = pack_params(w, b)                   # (8, 128), built once at init

    fwd = jax.jit(rpnet_decoder, static_argnames=("block_b",))

    x1 = jax.random.normal(k1, (batch, embed_dim), jnp.float32)
    x2 = jax.random.normal(k2, (batch, embed_dim), jnp.float32)
    out = jax.block_until_ready(fwd(x1, x2, packed))

    ref = jnp.abs(x1 - x2) @ w.T + b
    assert out.shape == (batch, 2)
    assert jnp.allclose(out, ref, atol=1e-4, rtol=1e-4), "mismatch vs reference"

    # Tiny batch exercises the pad-and-slice path.
    y1 = jax.random.normal(k3, (4, embed_dim), jnp.float32)
    y2 = jax.random.normal(k4, (4, embed_dim), jnp.float32)
    out_small = jax.block_until_ready(fwd(y1, y2, packed))
    ref_small = jnp.abs(y1 - y2) @ w.T + b
    assert out_small.shape == (4, 2)
    assert jnp.allclose(out_small, ref_small, atol=1e-4, rtol=1e-4), "small-batch mismatch"

    print("KERNEL_OK")
</pallas_src>

<mosaic_0001>
module attributes {stable_mosaic.version = 11 : i64} {
  func.func @_rpnet_decoder_kernel(%arg0: i32, %arg1: memref<16x128xf32, #tpu.memory_space<vmem>>, %arg2: memref<16x128xf32, #tpu.memory_space<vmem>>, %arg3: memref<8x128xf32, #tpu.memory_space<vmem>>, %arg4: memref<16x2xf32, #tpu.memory_space<vmem>>) attributes {dimension_semantics = [#tpu.dimension_semantics<parallel>], iteration_bounds = array<i64: 1>, scalar_prefetch = 0 : i64, scratch_operands = 0 : i64, tpu.core_type = #tpu.core_type<tc>, window_params = [{transform_indices = @transform_0, window_bounds = array<i64: 16, 128>}, {transform_indices = @transform_1, window_bounds = array<i64: 16, 128>}, {pipeline_mode = #tpu.pipeline_mode<synchronous>, transform_indices = @transform_2, window_bounds = array<i64: 8, 128>}, {transform_indices = @transform_3, window_bounds = array<i64: 16, 2>}]} {
    %c0 = arith.constant 0 : index
    %c0_0 = arith.constant 0 : index
    %0 = vector.load %arg1[%c0, %c0_0] : memref<16x128xf32, #tpu.memory_space<vmem>>, vector<16x128xf32>
    %c0_1 = arith.constant 0 : index
    %c0_2 = arith.constant 0 : index
    %1 = vector.load %arg2[%c0_1, %c0_2] : memref<16x128xf32, #tpu.memory_space<vmem>>, vector<16x128xf32>
    %2 = arith.subf %0, %1 : vector<16x128xf32>
    %3 = math.absf %2 : vector<16x128xf32>
    %c0_3 = arith.constant 0 : index
    %c0_4 = arith.constant 0 : index
    %4 = vector.load %arg3[%c0_3, %c0_4] : memref<8x128xf32, #tpu.memory_space<vmem>>, vector<1x128xf32>
    %5 = vector.broadcast %4 : vector<1x128xf32> to vector<16x128xf32>
    %6 = arith.mulf %3, %5 : vector<16x128xf32>
    %cst = arith.constant dense<0.000000e+00> : vector<16xf32>
    %7 = vector.multi_reduction <add>, %6, %cst [1] : vector<16x128xf32> to vector<16xf32>
    %8 = vector.shape_cast %7 : vector<16xf32> to vector<16x1xf32>
    %c1 = arith.constant 1 : index
    %c0_5 = arith.constant 0 : index
    %9 = vector.load %arg3[%c1, %c0_5] : memref<8x128xf32, #tpu.memory_space<vmem>>, vector<1x128xf32>
    %10 = vector.broadcast %9 : vector<1x128xf32> to vector<16x128xf32>
    %11 = arith.mulf %3, %10 : vector<16x128xf32>
    %cst_6 = arith.constant dense<0.000000e+00> : vector<16xf32>
    %12 = vector.multi_reduction <add>, %11, %cst_6 [1] : vector<16x128xf32> to vector<16xf32>
    %13 = vector.shape_cast %12 : vector<16xf32> to vector<16x1xf32>
    %14 = tpu.iota {dimensions = array<i32: 1>} : vector<16x2xi32>
    %c0_i32 = arith.constant 0 : i32
    %15 = vector.broadcast %c0_i32 : i32 to vector<16x2xi32>
    %16 = arith.cmpi eq, %14, %15 : vector<16x2xi32>
    %17 = vector.shape_cast %8 : vector<16x1xf32> to vector<16x1xf32>
    %18 = vector.broadcast %17 : vector<16x1xf32> to vector<16x2xf32>
    %19 = vector.shape_cast %13 : vector<16x1xf32> to vector<16x1xf32>
    %20 = vector.broadcast %19 : vector<16x1xf32> to vector<16x2xf32>
    %21 = arith.select %16, %18, %20 : vector<16x2xi1>, vector<16x2xf32>
    %c2 = arith.constant 2 : index
    %c0_7 = arith.constant 0 : index
    %22 = vector.load %arg3[%c2, %c0_7] : memref<8x128xf32, #tpu.memory_space<vmem>>, vector<1x2xf32>
    %23 = vector.broadcast %22 : vector<1x2xf32> to vector<16x2xf32>
    %24 = arith.addf %21, %23 : vector<16x2xf32>
    %c0_8 = arith.constant 0 : index
    %c0_9 = arith.constant 0 : index
    %25 = vector.load %arg4[%c0_8, %c0_9] : memref<16x2xf32, #tpu.memory_space<vmem>>, vector<16x2xf32>
    tpu.vector_store %arg4[%c0_8, %c0_9], %24 {strides = array<i32>} : memref<16x2xf32, #tpu.memory_space<vmem>>, vector<16x2xf32>,
    return
  }
  func.func @transform_0(%arg0: i32) -> (i32, i32) {
    %c0_i32 = arith.constant 0 : i32
    %c0_i32_0 = arith.constant 0 : i32
    return %arg0, %c0_i32 : i32, i32
  }
  func.func @transform_1(%arg0: i32) -> (i32, i32) {
    %c0_i32 = arith.constant 0 : i32
    %c0_i32_0 = arith.constant 0 : i32
    return %arg0, %c0_i32 : i32, i32
  }
  func.func @transform_2(%arg0: i32) -> (i32, i32) {
    %c0_i32 = arith.constant 0 : i32
    %c0_i32_0 = arith.constant 0 : i32
    %c0_i32_1 = arith.constant 0 : i32
    return %c0_i32, %c0_i32_0 : i32, i32
  }
  func.func @transform_3(%arg0: i32) -> (i32, i32) {
    %c0_i32 = arith.constant 0 : i32
    %c0_i32_0 = arith.constant 0 : i32
    return %arg0, %c0_i32 : i32, i32
  }
}

</mosaic_0001>

<bundles_post_ra>
// kernel: rpnet_decoder.1
= control target key start
LH: loop header
LB: loop body
LE: loop exit
PB: predicated region body
PF: predicated region fallthrough
CT: control target
= control target key end

     0   :  { %v44_v14 = vlaneseq  ;;  %vm56_vm1 = vcmask 15360   ;;  %s113_s0 = inlined_call_operand.vmem [shape: f32[16,128], index: 0, kind: input, shape index: {}]   ;;  %s114_s1 = inlined_call_operand.vmem [shape: f32[16,128], index: 1, kind: input, shape index: {}]   ;;  %s115_s2 = inlined_call_operand.vmem [shape: f32[8,128], index: 2, kind: input, shape index: {}]   ;;  %s116_s3 = inlined_call_operand.vmem [shape: f32[16,2], index: 3, kind: output, shape index: {}]  }
   0x1   :  { %v14_v0 = vld [vmem:[%s113_s0] sm:$0xff]  ;;  %v15_v3 = vld [vmem:[%s113_s0 + $0x8] sm:$0xff] }
   0x2   :  { %v16_v1 = vld [vmem:[%s114_s1] sm:$0xff]  ;;  %v17_v4 = vld [vmem:[%s114_s1 + $0x8] sm:$0xff]  ;;  %v45_v15 = vand.u32 127, %v44_v14 }
   0x3   :  { %v18_v2 = vsub.f32 %v14_v0, %v16_v1  ;;  %v64_v5 = vld [vmem:[%s115_s2 + $0x1] ss:$0 sm:$0xff]  ;;  %v63_v6 = vld [vmem:[%s115_s2] ss:$0 sm:$0xff]  ;;  %v19_v7 = vsub.f32 %v15_v3, %v17_v4  ;;  %v65_v16 = vld [vmem:[%s115_s2 + $0x2] ss:$0 sm:$0xff] }
   0x4   :  { %vm46_vm0 = vcmp.eq.s32.totalorder %v45_v15, 0 }
   0x5   :  { %v20_v8 = vand.u32 2147483647, %v18_v2  ;;  %v21_v9 = vand.u32 2147483647, %v19_v7 }
   0x7   :  { %v38_v10 = vmul.f32 %v64_v5, %v20_v8  ;;  %v27_v11 = vmul.f32 %v63_v6, %v20_v8  ;;  %v39_v12 = vmul.f32 %v64_v5, %v21_v9  ;;  %v28_v13 = vmul.f32 %v63_v6, %v21_v9 }
   0x9   :  { %40 = vadd.xlane.f32.xlu1 %v38_v10  ;;  %29 = vadd.xlane.f32.xlu0 %v27_v11 }
   0xd   :  { %42 = vadd.xlane.f32.xlu1 %v39_v12  ;;  %31 = vadd.xlane.f32.xlu0 %v28_v13 }
  0x92   :  { %v41_v17 = vpop.xlane.xlu1 %40  ;;  %v30_v18 = vpop.xlane.xlu0 %29 }
  0x93   :  { %v47_v19 = vsel %vm46_vm0, %v30_v18, %v41_v17 }
  0x94   :  { %v54_v20 = vadd.f32 %v65_v16, %v47_v19 }
  0x96   :  { %57 = vst.msk [vmem:[%s116_s3] sm:$0xff] %vm56_vm1, %v54_v20  ;;  %v43_v21 = vpop.xlane.xlu1 %42  ;;  %v32_v22 = vpop.xlane.xlu0 %31 }
  0x97   :  { %v48_v23 = vsel %vm46_vm0, %v32_v22, %v43_v21 }
  0x98   :  { %v55_v24 = vadd.f32 %v65_v16, %v48_v23 }
  0x9a   :  { %58 = vst.msk [vmem:[%s116_s3 + $0x8] sm:$0xff] %vm56_vm1, %v55_v24 }

</bundles_post_ra>
